<compile_context>
chip_gen: v6e
topology: v6e:2x2x1
jax: 0.10.0
libtpu: 0.0.40
codegen_flags: <defaults>
</compile_context>

<pallas_src>
import functools

import jax
import jax.numpy as jnp
import numpy as np
from jax.experimental import pallas as pl
from jax.experimental.pallas import tpu as pltpu


def _gp_kernel(row_ref, col_ref, first_ref, lap_ref, f_ref, o_ref, *,
               tile, f_resident):
    s = pl.program_id(0)

    if f_resident:
        # Features fully resident in VMEM: slice out the scheduled k-block.
        start = pl.multiple_of(col_ref[s] * tile, tile)
        f_blk = f_ref[pl.ds(start, tile), :]
    else:
        f_blk = f_ref[...]

    # L[row, col] @ F[col]   (bf16 x bf16 -> f32 accumulation on the MXU).
    contrib = jnp.dot(lap_ref[...], f_blk, preferred_element_type=jnp.float32)

    @pl.when(first_ref[s] == 1)
    def _():
        o_ref[...] = contrib          # first block of this row: direct write

    @pl.when(first_ref[s] == 0)
    def _():
        o_ref[...] += contrib         # later blocks of this row: accumulate


def _pick_tile(n):
    # Largest square tile in {512, 256, 128} dividing n, preferring >= 2 row
    # blocks so the output is accumulated in more than one run.
    for t in (512, 256, 128):
        if n % t == 0 and n // t >= 2:
            return t
    for t in (512, 256, 128):
        if n % t == 0:
            return t
    return n  # fallback: a single full-extent block


def _build_schedule(lap_np, t):
    """Flat schedule of nonzero TxT blocks of L, sorted by row block.

    Returns int32 arrays (row, col, first); first[s]==1 marks the first
    scheduled block of its row (accumulator init step)."""
    n = lap_np.shape[0]
    nb = n // t
    occ = lap_np.reshape(nb, t, nb, t).any(axis=(1, 3))
    np.fill_diagonal(occ, True)   # every output row block is visited >= once
    rows, cols, firsts = [], [], []
    for i in range(nb):
        nz = np.nonzero(occ[i])[0]
        rows.extend([i] * nz.size)
        cols.extend(nz.tolist())
        firsts.extend([1] + [0] * (nz.size - 1))
    return (np.asarray(rows, np.int32),
            np.asarray(cols, np.int32),
            np.asarray(firsts, np.int32))


def make_gp_layer(laplacian, self_loop=None, *, block=None):
    """Precompute (once per graph) and return apply(features) = (L + S) @ features."""
    lap_np = np.asarray(jax.device_get(laplacian), dtype=np.float32)
    n = lap_np.shape[0]
    assert lap_np.shape == (n, n)

    if self_loop is not None:
        sl_np = np.asarray(jax.device_get(self_loop), dtype=np.float32)
        assert sl_np.shape == (n, n)
        diag = np.diag(sl_np).copy()
        assert np.allclose(sl_np - np.diag(diag), 0.0), (
            "self_loop must be diagonal (GACFMask builds it with getSparseEye)")
    else:
        diag = np.ones((n,), np.float32)
    # Fold the self-loop into the Laplacian: (L + S) @ F == (L + diag(S)) @ F.
    lap_np = lap_np + np.diag(diag)

    t = block if block is not None else _pick_tile(n)
    assert n % t == 0, "num_nodes must be divisible by the chosen tile size"

    row_np, col_np, first_np = _build_schedule(lap_np, t)
    num_steps = int(row_np.size)

    # bf16 operands in HBM (f32 accumulation in-kernel); cast once per graph.
    lap_bf16 = jnp.asarray(lap_np, dtype=jnp.bfloat16)
    row_ids = jnp.asarray(row_np)
    col_ids = jnp.asarray(col_np)
    first_flags = jnp.asarray(first_np)

    def apply(features):
        N, D = features.shape
        assert N == n, "features rows must match the Laplacian size"
        f_bf16 = features.astype(jnp.bfloat16)

        # Keep features fully resident in VMEM when the (double-buffered)
        # footprint stays well inside v7x's 64 MiB VMEM; else per-block fetch.
        f_resident = (2 * N * D * 2) <= (24 << 20)

        lap_spec = pl.BlockSpec((t, t), lambda s, r, c, fst: (r[s], c[s]))
        if f_resident:
            f_spec = pl.BlockSpec((N, D), lambda s, r, c, fst: (0, 0))
            f_bytes = N * D * 2
            f_vmem = 2 * N * D * 2
        else:
            f_spec = pl.BlockSpec((t, D), lambda s, r, c, fst: (c[s], 0))
            f_bytes = num_steps * t * D * 2
            f_vmem = 2 * t * D * 2
        out_spec = pl.BlockSpec((t, D), lambda s, r, c, fst: (r[s], 0))

        vmem_needed = 2 * t * t * 2 + 2 * t * D * 4 + f_vmem
        vmem_limit = int(min(max(vmem_needed + (8 << 20), 16 << 20), 48 << 20))

        kernel = functools.partial(_gp_kernel, tile=t, f_resident=f_resident)
        out = pl.pallas_call(
            kernel,
            out_shape=jax.ShapeDtypeStruct((N, D), jnp.float32),
            grid_spec=pltpu.PrefetchScalarGridSpec(
                num_scalar_prefetch=3,
                grid=(num_steps,),
                in_specs=[lap_spec, f_spec],
                out_specs=out_spec,
            ),
            compiler_params=pltpu.CompilerParams(
                dimension_semantics=("arbitrary",),
                vmem_limit_bytes=vmem_limit,
            ),
            cost_estimate=pl.CostEstimate(
                flops=2 * num_steps * t * t * D,
                transcendentals=0,
                bytes_accessed=num_steps * t * t * 2 + f_bytes + N * D * 4,
            ),
        )(row_ids, col_ids, first_flags, lap_bf16, f_bf16)
        return out.astype(features.dtype)

    return apply


def gp_layer(features, laplacian, self_loop=None, *, block=None):
    """One-shot convenience wrapper (host prep not amortized across calls)."""
    return make_gp_layer(laplacian, self_loop, block=block)(features)


if __name__ == "__main__":
    # Small, deterministic example: 256-node graph, 128-dim embeddings.
    num_nodes = 256
    embed_dim = 128

    key = jax.random.PRNGKey(0)
    k_feat, k_adj, k_mask = jax.random.split(key, 3)

    features = jax.random.normal(k_feat, (num_nodes, embed_dim), dtype=jnp.float32)

    # Deterministic "sparse" normalized Laplacian-like matrix (densified).
    adj_vals = jax.random.uniform(k_adj, (num_nodes, num_nodes), dtype=jnp.float32)
    mask = (jax.random.uniform(k_mask, (num_nodes, num_nodes)) < 0.05).astype(jnp.float32)
    adj = adj_vals * mask
    deg = jnp.maximum(adj.sum(axis=1, keepdims=True), 1.0)
    laplacian = adj / deg                      # row-normalized adjacency (dense)

    self_loop = jnp.eye(num_nodes, dtype=jnp.float32)  # sparse eye, densified

    gp = jax.jit(make_gp_layer(laplacian, self_loop))  # per-graph prep cached
    out = jax.block_until_ready(gp(features))

    # Reference: (L + I) @ features, same as torch.sparse.mm(L1, features).
    ref = (laplacian + self_loop) @ features

    assert out.shape == (num_nodes, embed_dim)
    assert out.dtype == features.dtype
    # bf16 operands with f32 accumulation -> slightly looser tolerance.
    assert jnp.allclose(out, ref, atol=3e-2, rtol=3e-2), "mismatch vs reference"

    print("KERNEL_OK")
</pallas_src>

<mosaic_0001>
module attributes {stable_mosaic.version = 11 : i64} {
  func.func @_gp_kernel(%arg0: i32, %arg1: memref<4xi32, #tpu.memory_space<smem>>, %arg2: memref<4xi32, #tpu.memory_space<smem>>, %arg3: memref<4xi32, #tpu.memory_space<smem>>, %arg4: memref<128x128xbf16, #tpu.memory_space<vmem>>, %arg5: memref<256x128xbf16, #tpu.memory_space<vmem>>, %arg6: memref<128x128xf32, #tpu.memory_space<vmem>>) attributes {dimension_semantics = [#tpu.dimension_semantics<arbitrary>], iteration_bounds = array<i64: 4>, scalar_prefetch = 3 : i64, scratch_operands = 0 : i64, tpu.core_type = #tpu.core_type<tc>, window_params = [{transform_indices = @transform_0, window_bounds = array<i64: 128, 128>}, {pipeline_mode = #tpu.pipeline_mode<synchronous>, transform_indices = @transform_1, window_bounds = array<i64: 256, 128>}, {transform_indices = @transform_2, window_bounds = array<i64: 128, 128>}]} {
    %0 = arith.index_cast %arg0 : i32 to index
    %1 = memref.load %arg2[%0] : memref<4xi32, #tpu.memory_space<smem>>
    %c128_i32 = arith.constant 128 : i32
    %2 = arith.muli %1, %c128_i32 : i32
    %3 = tpu.assume_multiple %2, 128 : i32
    %4 = arith.index_cast %3 : i32 to index
    %c0 = arith.constant 0 : index
    %5 = vector.load %arg5[%4, %c0] : memref<256x128xbf16, #tpu.memory_space<vmem>>, vector<128x128xbf16>
    %c0_0 = arith.constant 0 : index
    %c0_1 = arith.constant 0 : index
    %6 = vector.load %arg4[%c0_0, %c0_1] : memref<128x128xbf16, #tpu.memory_space<vmem>>, vector<128x128xbf16>
    %cst = arith.constant dense<0.000000e+00> : vector<128x128xf32>
    %7 = tpu.matmul %6, %5, %cst {dimension_numbers = #tpu.dot_dimension_numbers<[1], [0], [0], [1], [0, 0, 1, 1], [], []>} : vector<128x128xbf16>, vector<128x128xbf16>, vector<128x128xf32> -> vector<128x128xf32>
    %8 = arith.index_cast %arg0 : i32 to index
    %9 = memref.load %arg3[%8] : memref<4xi32, #tpu.memory_space<smem>>
    %c1_i32 = arith.constant 1 : i32
    %10 = arith.cmpi eq, %9, %c1_i32 : i32
    %11 = arith.extui %10 : i1 to i32
    %c0_i32 = arith.constant 0 : i32
    %12 = arith.cmpi ne, %11, %c0_i32 : i32
    scf.if %12 {
      %c0_4 = arith.constant 0 : index
      %c0_5 = arith.constant 0 : index
      %18 = vector.load %arg6[%c0_4, %c0_5] : memref<128x128xf32, #tpu.memory_space<vmem>>, vector<128x128xf32>
      tpu.vector_store %arg6[%c0_4, %c0_5], %7 {strides = array<i32>} : memref<128x128xf32, #tpu.memory_space<vmem>>, vector<128x128xf32>,
    } else {
    }
    %13 = arith.index_cast %arg0 : i32 to index
    %14 = memref.load %arg3[%13] : memref<4xi32, #tpu.memory_space<smem>>
    %c0_i32_2 = arith.constant 0 : i32
    %15 = arith.cmpi eq, %14, %c0_i32_2 : i32
    %16 = arith.extui %15 : i1 to i32
    %c0_i32_3 = arith.constant 0 : i32
    %17 = arith.cmpi ne, %16, %c0_i32_3 : i32
    scf.if %17 {
      %c0_4 = arith.constant 0 : index
      %c0_5 = arith.constant 0 : index
      %18 = vector.load %arg6[%c0_4, %c0_5] : memref<128x128xf32, #tpu.memory_space<vmem>>, vector<128x128xf32>
      %19 = arith.addf %18, %7 : vector<128x128xf32>
      %c0_6 = arith.constant 0 : index
      %c0_7 = arith.constant 0 : index
      %20 = vector.load %arg6[%c0_6, %c0_7] : memref<128x128xf32, #tpu.memory_space<vmem>>, vector<128x128xf32>
      tpu.vector_store %arg6[%c0_6, %c0_7], %19 {strides = array<i32>} : memref<128x128xf32, #tpu.memory_space<vmem>>, vector<128x128xf32>,
    } else {
    }
    return
  }
  func.func @transform_0(%arg0: i32, %arg1: memref<4xi32, #tpu.memory_space<smem>>, %arg2: memref<4xi32, #tpu.memory_space<smem>>, %arg3: memref<4xi32, #tpu.memory_space<smem>>) -> (i32, i32) {
    %0 = arith.index_cast %arg0 : i32 to index
    %1 = memref.load %arg1[%0] : memref<4xi32, #tpu.memory_space<smem>>
    %2 = arith.index_cast %arg0 : i32 to index
    %3 = memref.load %arg2[%2] : memref<4xi32, #tpu.memory_space<smem>>
    %c0_i32 = arith.constant 0 : i32
    return %1, %3 : i32, i32
  }
  func.func @transform_1(%arg0: i32, %arg1: memref<4xi32, #tpu.memory_space<smem>>, %arg2: memref<4xi32, #tpu.memory_space<smem>>, %arg3: memref<4xi32, #tpu.memory_space<smem>>) -> (i32, i32) {
    %c0_i32 = arith.constant 0 : i32
    %c0_i32_0 = arith.constant 0 : i32
    %c0_i32_1 = arith.constant 0 : i32
    return %c0_i32, %c0_i32_0 : i32, i32
  }
  func.func @transform_2(%arg0: i32, %arg1: memref<4xi32, #tpu.memory_space<smem>>, %arg2: memref<4xi32, #tpu.memory_space<smem>>, %arg3: memref<4xi32, #tpu.memory_space<smem>>) -> (i32, i32) {
    %0 = arith.index_cast %arg0 : i32 to index
    %1 = memref.load %arg1[%0] : memref<4xi32, #tpu.memory_space<smem>>
    %c0_i32 = arith.constant 0 : i32
    %c0_i32_0 = arith.constant 0 : i32
    return %1, %c0_i32 : i32, i32
  }
}

</mosaic_0001>

<bundles_post_ra>
// kernel: apply.1
= control target key start
LH: loop header
LB: loop body
LE: loop exit
PB: predicated region body
PF: predicated region fallthrough
CT: control target
= control target key end

     0   :  { %s1277_s0 = inlined_call_operand.vmem [shape: s32[4], index: 0, kind: input, shape index: {}]   ;;  %s1278_s3 = inlined_call_operand.vmem [shape: bf16[256,256], index: 3, kind: input, shape index: {}]   ;;  %s1279_s4 = inlined_call_operand.vmem [shape: bf16[256,128], index: 4, kind: input, shape index: {}]   ;;  %s1280_s5 = inlined_call_operand.hbm [shape: f32[256,128], index: 5, kind: output, shape index: {}]   ;;  %s1281_s1 = inlined_call_operand.vmem [shape: s32[4], index: 1, kind: input, shape index: {}]   ;;  %s1282_s2 = inlined_call_operand.vmem [shape: s32[4], index: 2, kind: input, shape index: {}]  }
   0x1   :  { %s10_s20 = sshll.u32 %s1277_s0, 4  ;;  %s14_s23 = sshll.u32 %s1281_s1, 4  ;;  %s11_s20 = int_to_ptr.vmem [resolvable:$true] %s10_s20  ;;  %s15_s23 = int_to_ptr.vmem [resolvable:$true] %s14_s23 }
   0x2   :  { %s852_s24 = scalar_lea.vmem %s11_s20, 16  ;;  %p857_p1 = scmp.lt.s32.totalorder %s11_s20, %s11_s20 }
   0x3   :  { %p853_p0 = scmp.ne.s32.totalorder %s11_s20, %s852_s24  ;;  %p858_p2 = scmp.lt.s32.totalorder %s852_s24, %s852_s24 }
   0x5   :  { %p859_p3 = por %p858_p2, %p857_p1 }
   0x7   :  { %p860_p4 = pnand %p859_p3, %p853_p0 }
   0x9   :  { %863 = shalt.err (!%p860_p4)  }
   0xa   :  { %s968_s25 = smov [#allocation3]   ;;  %s864_s26 = scalar_lea.vmem %s15_s23, 16 }
   0xb   :  { %13 = dma.vmem_to_smem %s11_s20, 16, %s968_s25, [#allocation2] }
   0xc   :  { %p865_p5 = scmp.ne.s32.totalorder %s15_s23, %s864_s26  ;;  %p869_p6 = scmp.lt.s32.totalorder %s15_s23, %s15_s23 }
   0xd   :  { %p870_p7 = scmp.lt.s32.totalorder %s864_s26, %s864_s26 }
   0xf   :  { %p871_p8 = por %p870_p7, %p869_p6 }
  0x11   :  { %p872_p9 = pnand %p871_p8, %p865_p5 }
  0x13   :  { %875 = shalt.err (!%p872_p9)  }
  0x14   :  { %s969_s0 = smov [#allocation4]   ;;  %s18_s28 = sshll.u32 %s1282_s2, 4  ;;  %s19_s28 = int_to_ptr.vmem [resolvable:$true] %s18_s28 }
  0x15   :  { %17 = dma.vmem_to_smem %s15_s23, 16, %s969_s0, [#allocation2] }
  0x16   :  { %s876_s29 = scalar_lea.vmem %s19_s28, 16  ;;  %p881_p11 = scmp.lt.s32.totalorder %s19_s28, %s19_s28 }
  0x17   :  { %p877_p10 = scmp.ne.s32.totalorder %s19_s28, %s876_s29  ;;  %p882_p12 = scmp.lt.s32.totalorder %s876_s29, %s876_s29 }
  0x19   :  { %p883_p13 = por %p882_p12, %p881_p11 }
  0x1b   :  { %p884_p0 = pnand %p883_p13, %p877_p10 }
  0x1d   :  { %887 = shalt.err (!%p884_p0)  }
  0x1e   :  { %s970_s30 = smov [#allocation5]  }
  0x1f   :  { %21 = dma.vmem_to_smem %s19_s28, 16, %s970_s30, [#allocation2] }
  0x20   :  { %938 = dma.done.wait [#allocation2], 48 }
  0x21   :  { %939 = vsyncadd [#allocation2], 4294967248 }
  0x22   :  { %23 = sfence }
  0x23   :  { %24 = vsyncpa [#allocation8], 0 }
  0x24   :  { %26 = vsyncpa [#allocation8 + $0x1], 0  ;;  %s1013_s6 = smov 0   ;;  %s1015_s7 = smov 0  }
  0x25   :  { %s1017_s2 = smov 0   ;;  %s1019_s8 = smov 0  }
  0x26   :  { %s1021_s9 = smov 0   ;;  %s1023_s10 = smov 0  }
  0x27 LB: > { %s1044_s11 = sadd.s32 4294967295, %s966_s10   ;;  %s1047_s12 = sadd.s32 1, %s966_s10   ;;  %s966_s10 = sphi %s1023_s10, %s1291_s10   ;;  %s962_s9 = sphi %s1021_s9, %s1290_s9   ;;  %s958_s8 = sphi %s1019_s8, %s1289_s8   ;;  %s954_s2 = sphi %s1017_s2, %s1288_s2   ;;  %s950_s7 = sphi %s1015_s7, %s1287_s7   ;;  %s946_s6 = sphi %s1013_s6, %s1286_s6  }
  0x28   : > { %s36_s13 = sld [smem:[#allocation3 + %s966_s10]]  ;;  %s673_s14 = sadd.s32 4294967294, %s966_s10  }
  0x29   : > { %s37_s15 = sld [smem:[#allocation4 + %s966_s10]]  ;;  %p52_p1 = scmp.ne.s32.totalorder %s962_s9, %s958_s8 }
  0x2a   : > { %s38_s16 = sld [smem:[#allocation3 + %s1047_s12]]  ;;  %p53_p2 = scmp.eq.s32.totalorder %s966_s10, 0 }
  0x2b   : > { %s39_s17 = sld [smem:[#allocation4 + %s1047_s12]]  ;;  %s45_s18 = sadd.s32 1, %s962_s9 }
  0x2c   : > { %s89_s19 = sld [smem:[#allocation3 + %s966_s10]]  ;;  %p1059_p3 = por %p53_p2, %p52_p1 }
  0x2d   : > { %s90_s21 = sld [smem:[#allocation3 + %s1047_s12]]  ;;  %p104_p4 = scmp.ne.s32.totalorder %s954_s2, %s950_s7 }
  0x2e   : > { %p105_p5 = scmp.eq.s32.totalorder %s1044_s11, 3  ;;  %p110_p6 = scmp.ne.s32.totalorder %s950_s7, %s946_s6 }
  0x2f   : > { %p111_p7 = scmp.eq.s32.totalorder %s673_s14, 3  ;;  %s94_s0 = sadd.s32 1, %s954_s2 }
  0x30   : > { %s40_s22 = ssub.s32 %s36_s13, %s38_s16  ;;  %p1069_p8 = por %p105_p5, %p104_p4 }
  0x31   : > { %s41_s24 = ssub.s32 %s37_s15, %s39_s17  ;;  %p1073_p9 = por %p111_p7, %p110_p6 }
  0x32   : > { %s42_s26 = sor.u32 %s41_s24, %s40_s22  ;;  %p675_p12 = scmp.ge.s32.totalorder %s966_s10, 4 }
  0x33   : > { %p43_p10 = scmp.eq.s32.totalorder %s42_s26, 0  ;;  %s91_s1 = ssub.s32 %s89_s19, %s90_s21 }
  0x34   : > { %p92_p11 = scmp.eq.s32.totalorder %s91_s1, 0  ;;  %130 = sbr.rel (%p675_p12) target bundleno = 78 (0x4e), region = 20 }
  0x35   : > { %s1079_s27 = scalar_select %p43_p10, %s962_s9, %s45_s18  }
  0x36   : > { %s1082_s28 = scalar_select %p92_p11, %s954_s2, %s94_s0  }
  0x39   : > { %133 = sbr.rel (!%p1059_p3) target bundleno = 78 (0x4e), region = 24  ;;  %s138_s29 = sld [smem:[#allocation3 + %s966_s10]] (%p1059_p3) }
  0x3a   : > { %s139_s30 = sld [smem:[#allocation4 + %s966_s10]] (%p1059_p3)  ;;  %s135_s13 = sand.u32 (%p1059_p3), 1, %s962_s9  }
  0x3b   : > { %s676_s14 = sshll.u32 (%p1059_p3), %s135_s13, 6 }
  0x3c   : > { %s137_s20 = scalar_lea.vmem (%p1059_p3), [#allocation6], %s676_s14 }
  0x3f   : > { %s708_s15 = sshll.u32 %s138_s29, 5 }
  0x40   : > { %s142_s16 = sadd.s32 %s708_s15, %s139_s30 }
  0x41   : > { %s679_s17 = sshll.u32 %s142_s16, 2 }
  0x42   : > { %s1093_s21 = scalar_lea.vmem %s1278_s3, %s679_s17 }
  0x43   : > { %v161_v0 = vld [vmem:[%s1093_s21] sm:$0xf]  ;;  %v163_v1 = vld [vmem:[%s1093_s21 + $0x8] sm:$0xf]  ;;  %v165_v2 = vld [vmem:[%s1093_s21 + $0x10] sm:$0xf] }
  0x44   : > { %162 = vst [vmem:[%s137_s20] sm:$0xf] %v161_v0  ;;  %164 = vst [vmem:[%s137_s20 + $0x4] sm:$0xf] %v163_v1  ;;  %v167_v3 = vld [vmem:[%s1093_s21 + $0x18] sm:$0xf] }
  0x45   : > { %166 = vst [vmem:[%s137_s20 + $0x8] sm:$0xf] %v165_v2  ;;  %v169_v4 = vld [vmem:[%s1093_s21 + $0x20] sm:$0xf]  ;;  %v171_v5 = vld [vmem:[%s1093_s21 + $0x28] sm:$0xf] }
  0x46   : > { %168 = vst [vmem:[%s137_s20 + $0xc] sm:$0xf] %v167_v3  ;;  %170 = vst [vmem:[%s137_s20 + $0x10] sm:$0xf] %v169_v4  ;;  %v173_v6 = vld [vmem:[%s1093_s21 + $0x30] sm:$0xf] }
  0x47   : > { %172 = vst [vmem:[%s137_s20 + $0x14] sm:$0xf] %v171_v5  ;;  %v175_v7 = vld [vmem:[%s1093_s21 + $0x38] sm:$0xf]  ;;  %v177_v8 = vld [vmem:[%s1093_s21 + $0x40] sm:$0xf] }
  0x48   : > { %174 = vst [vmem:[%s137_s20 + $0x18] sm:$0xf] %v173_v6  ;;  %176 = vst [vmem:[%s137_s20 + $0x1c] sm:$0xf] %v175_v7  ;;  %v179_v9 = vld [vmem:[%s1093_s21 + $0x48] sm:$0xf] }
  0x49   : > { %178 = vst [vmem:[%s137_s20 + $0x20] sm:$0xf] %v177_v8  ;;  %v181_v10 = vld [vmem:[%s1093_s21 + $0x50] sm:$0xf]  ;;  %v183_v11 = vld [vmem:[%s1093_s21 + $0x58] sm:$0xf] }
  0x4a   : > { %180 = vst [vmem:[%s137_s20 + $0x24] sm:$0xf] %v179_v9  ;;  %182 = vst [vmem:[%s137_s20 + $0x28] sm:$0xf] %v181_v10  ;;  %v185_v12 = vld [vmem:[%s1093_s21 + $0x60] sm:$0xf] }
  0x4b   : > { %184 = vst [vmem:[%s137_s20 + $0x2c] sm:$0xf] %v183_v11  ;;  %v187_v13 = vld [vmem:[%s1093_s21 + $0x68] sm:$0xf]  ;;  %v189_v14 = vld [vmem:[%s1093_s21 + $0x70] sm:$0xf] }
  0x4c   : > { %186 = vst [vmem:[%s137_s20 + $0x30] sm:$0xf] %v185_v12  ;;  %188 = vst [vmem:[%s137_s20 + $0x34] sm:$0xf] %v187_v13  ;;  %v191_v15 = vld [vmem:[%s1093_s21 + $0x78] sm:$0xf] }
  0x4d   : > { %190 = vst [vmem:[%s137_s20 + $0x38] sm:$0xf] %v189_v14  ;;  %192 = vst [vmem:[%s137_s20 + $0x3c] sm:$0xf] %v191_v15 }
  0x4e PF: > { %p680_p13 = scmp.ge.s32.totalorder %s966_s10, 1  ;;  %p247_p0 = scmp.lt.s32.totalorder %s966_s10, 5 }
  0x50   : > { %p248_p1 = pnand %p680_p13, %p247_p0 }
  0x51   : > { %s272_s22 = sand.u32 (!%p248_p1), 1, %s950_s7   ;;  %s281_s24 = sld [smem:[#allocation4 + %s1044_s11]] (!%p248_p1) }
  0x52   : > { %251 = sbr.rel (%p248_p1) target bundleno = 389 (0x185), region = 65  ;;  %s1117_s26 = sshll.u32 (!%p248_p1), %s272_s22, 7 }
  0x53   : > { %s254_s0 = sand.u32 (!%p248_p1), 1, %s958_s8   ;;  %s512_s8 = sld [smem:[#allocation5 + %s1044_s11]] (!%p248_p1) }
  0x54   : > { %s681_s1 = sshll.u32 (!%p248_p1), %s254_s0, 6  ;;  %s1155_s18 = scalar_lea.vmem (!%p248_p1), [#allocation7], %s1117_s26 }
  0x55   : > { %s1120_s29 = scalar_lea.vmem (!%p248_p1), [#allocation6], %s681_s1 }
  0x57   : > { %v844_v16 = vld [vmem:[%s1120_s29] sm:$0xff]   ;;  %s683_s30 = sshll.u32 %s281_s24, 7  ;;  %v846_v26 = vld [vmem:[%s1120_s29 + $0x8] sm:$0xff]   ;;  %v848_v28 = vld [vmem:[%s1120_s29 + $0x10] sm:$0xff]  }
  0x58   : > { %v845_v17 = vld [vmem:[%s1120_s29 + $0x20] sm:$0xff]   ;;  %742 = vmatprep.mubr.bf16.mxu0 %v844_v16  ;;  %s283_s13 = sshra.s32 %s683_s30, 3  ;;  %v847_v27 = vld [vmem:[%s1120_s29 + $0x28] sm:$0xff]   ;;  %v849_v29 = vld [vmem:[%s1120_s29 + $0x30] sm:$0xff]  }
  0x59   : > { %750 = vmatprep.mubr.bf16.mxu1 %v845_v17  ;;  %s684_s14 = sshll.u32 %s283_s13, 2  ;;  %v850_v30 = vld [vmem:[%s1120_s29 + $0x18] sm:$0xff]   ;;  %p701_p2 = scmp.ne.s32.totalorder %s512_s8, 1 }
  0x5a   : > { %s1127_s17 = scalar_lea.vmem %s1279_s4, %s684_s14  ;;  %v851_v31 = vld [vmem:[%s1120_s29 + $0x38] sm:$0xff]  }
  0x5b   : > { %v836_v18 = vld [vmem:[%s1127_s17 + $0x38] sm:$0xff]   ;;  %v837_v19 = vld [vmem:[%s1127_s17 + $0x30] sm:$0xff]   ;;  %v838_v20 = vld [vmem:[%s1127_s17 + $0x28] sm:$0xff]  }
  0x5c   : > { %726 = vmatprep.subr.bf16.mxu0 %v836_v18  ;;  %758 = vmatprep.subr.bf16.mxu1 %v836_v18  ;;  %v839_v21 = vld [vmem:[%s1127_s17 + $0x20] sm:$0xff]   ;;  %v840_v22 = vld [vmem:[%s1127_s17 + $0x18] sm:$0xff]   ;;  %v841_v23 = vld [vmem:[%s1127_s17 + $0x10] sm:$0xff]  }
  0x5d   : > { %727 = vmatpush3.bf16.msra.mxu0 %v836_v18  ;;  %766 = vmatpush3.bf16.msra.mxu1 %v836_v18  ;;  %v842_v24 = vld [vmem:[%s1127_s17 + $0x8] sm:$0xff]   ;;  %v843_v25 = vld [vmem:[%s1127_s17] sm:$0xff]  }
  0x5e   : > { %728 = vmatprep.subr.bf16.mxu0 %v837_v19  ;;  %759 = vmatprep.subr.bf16.mxu1 %v837_v19 }
  0x61   : > { %729 = vmatpush3.bf16.msra.mxu0 %v837_v19  ;;  %767 = vmatpush3.bf16.msra.mxu1 %v837_v19 }
  0x62   : > { %730 = vmatprep.subr.bf16.mxu0 %v838_v20  ;;  %760 = vmatprep.subr.bf16.mxu1 %v838_v20 }
  0x65   : > { %731 = vmatpush3.bf16.msra.mxu0 %v838_v20  ;;  %768 = vmatpush3.bf16.msra.mxu1 %v838_v20 }
  0x66   : > { %732 = vmatprep.subr.bf16.mxu0 %v839_v21  ;;  %761 = vmatprep.subr.bf16.mxu1 %v839_v21 }
  0x69   : > { %733 = vmatpush3.bf16.msra.mxu0 %v839_v21  ;;  %769 = vmatpush3.bf16.msra.mxu1 %v839_v21 }
  0x6a   : > { %734 = vmatprep.subr.bf16.mxu0 %v840_v22  ;;  %762 = vmatprep.subr.bf16.mxu1 %v840_v22 }
  0x6d   : > { %735 = vmatpush3.bf16.msra.mxu0 %v840_v22  ;;  %770 = vmatpush3.bf16.msra.mxu1 %v840_v22 }
  0x6e   : > { %736 = vmatprep.subr.bf16.mxu0 %v841_v23  ;;  %763 = vmatprep.subr.bf16.mxu1 %v841_v23 }
  0x71   : > { %737 = vmatpush3.bf16.msra.mxu0 %v841_v23  ;;  %771 = vmatpush3.bf16.msra.mxu1 %v841_v23 }
  0x72   : > { %738 = vmatprep.subr.bf16.mxu0 %v842_v24  ;;  %764 = vmatprep.subr.bf16.mxu1 %v842_v24 }
  0x75   : > { %739 = vmatpush3.bf16.msra.mxu0 %v842_v24  ;;  %772 = vmatpush3.bf16.msra.mxu1 %v842_v24 }
  0x76   : > { %740 = vmatprep.subr.bf16.mxu0 %v843_v25  ;;  %765 = vmatprep.subr.bf16.mxu1 %v843_v25 }
  0x79   : > { %741 = vmatpush3.bf16.msra.mxu0 %v843_v25  ;;  %773 = vmatpush3.bf16.msra.mxu1 %v843_v25 }
  0x7c   : > { %743 = vmatmul.mubr.bf16.vlgmr.msra.gmra.mxu0 %v846_v26  ;;  %751 = vmatmul.mubr.bf16.vlgmr.msra.gmra.mxu1 %v847_v27 }
  0x7d   : > { %746 = vmatprep.mubr.bf16.mxu0 %v848_v28  ;;  %754 = vmatprep.mubr.bf16.mxu1 %v849_v29 }
  0x84   : > { %747 = vmatmul.mubr.bf16.gmra.mxu0 %v850_v30  ;;  %755 = vmatmul.mubr.bf16.gmra.mxu1 %v851_v31 }
 0x13c   : > { %v744_v32 = vpop.f32.mrf.mxu0  ;;  %v1144_v33 = vpop.f32.mrf.mxu1 }
 0x13e   : > { %v449_v34 = vpop.f32.mrf.mxu0  ;;  %v481_v35 = vpop.f32.mrf.mxu1 }
 0x140   : > { %v745_v36 = vpop.f32.mrf.mxu0  ;;  %v1146_v37 = vpop.f32.mrf.mxu1 }
 0x142   : > { %v452_v38 = vpop.f32.mrf.mxu0  ;;  %v484_v39 = vpop.f32.mrf.mxu1 }
 0x144   : > { %v748_v40 = vpop.f32.mrf.mxu0  ;;  %v1148_v41 = vpop.f32.mrf.mxu1 }
 0x146   : > { %v465_v42 = vpop.f32.mrf.mxu0  ;;  %v1150_v43 = vpop.f32.mrf.mxu1  ;;  %516 = sbr.rel (%p701_p2) target bundleno = 339 (0x153), region = 73 }
 0x148   : > { %v749_v44 = vpop.f32.mrf.mxu0  ;;  %v1152_v45 = vpop.f32.mrf.mxu1 }
 0x14a   : > { %v468_v46 = vpop.f32.mrf.mxu0  ;;  %v500_v47 = vpop.f32.mrf.mxu1 }
 0x14b   : > { %517 = vst [vmem:[%s1155_s18] sm:$0xff] %v449_v34  ;;  %518 = vst [vmem:[%s1155_s18 + $0x8] sm:$0xff] %v452_v38 }
 0x14c   : > { %519 = vst [vmem:[%s1155_s18 + $0x10] sm:$0xff] %v744_v32  ;;  %520 = vst [vmem:[%s1155_s18 + $0x18] sm:$0xff] %v745_v36 }
 0x14d   : > { %521 = vst [vmem:[%s1155_s18 + $0x20] sm:$0xff] %v465_v42  ;;  %522 = vst [vmem:[%s1155_s18 + $0x28] sm:$0xff] %v468_v46 }
 0x14e   : > { %523 = vst [vmem:[%s1155_s18 + $0x30] sm:$0xff] %v748_v40  ;;  %524 = vst [vmem:[%s1155_s18 + $0x38] sm:$0xff] %v749_v44 }
 0x14f   : > { %525 = vst [vmem:[%s1155_s18 + $0x40] sm:$0xff] %v481_v35  ;;  %526 = vst [vmem:[%s1155_s18 + $0x48] sm:$0xff] %v484_v39 }
 0x150   : > { %527 = vst [vmem:[%s1155_s18 + $0x50] sm:$0xff] %v1144_v33  ;;  %528 = vst [vmem:[%s1155_s18 + $0x58] sm:$0xff] %v1146_v37 }
 0x151   : > { %529 = vst [vmem:[%s1155_s18 + $0x60] sm:$0xff] %v1150_v43  ;;  %530 = vst [vmem:[%s1155_s18 + $0x68] sm:$0xff] %v500_v47 }
 0x152   : > { %531 = vst [vmem:[%s1155_s18 + $0x70] sm:$0xff] %v1148_v41  ;;  %532 = vst [vmem:[%s1155_s18 + $0x78] sm:$0xff] %v1152_v45 }
 0x153 PF: > { %s533_s19 = sld [smem:[#allocation5 + %s1044_s11]] }
 0x159   : > { %p702_p3 = scmp.ne.s32.totalorder %s533_s19, 0 }
 0x15b   : > { %537 = sbr.rel (%p702_p3) target bundleno = 363 (0x16b), region = 77 }
 0x160   : > { %v538_v48 = vld [vmem:[%s1155_s18] sm:$0xff]  ;;  %v539_v49 = vld [vmem:[%s1155_s18 + $0x8] sm:$0xff]  ;;  %v540_v50 = vld [vmem:[%s1155_s18 + $0x10] sm:$0xff] }
 0x161   : > { %v554_v51 = vadd.f32 %v538_v48, %v449_v34  ;;  %v555_v52 = vadd.f32 %v539_v49, %v452_v38  ;;  %v556_v53 = vadd.f32 %v744_v32, %v540_v50  ;;  %v541_v54 = vld [vmem:[%s1155_s18 + $0x18] sm:$0xff]  ;;  %v542_v55 = vld [vmem:[%s1155_s18 + $0x20] sm:$0xff]  ;;  %v543_v56 = vld [vmem:[%s1155_s18 + $0x28] sm:$0xff] }
 0x162   : > { %v557_v57 = vadd.f32 %v745_v36, %v541_v54  ;;  %v558_v58 = vadd.f32 %v542_v55, %v465_v42  ;;  %v559_v59 = vadd.f32 %v543_v56, %v468_v46  ;;  %v544_v60 = vld [vmem:[%s1155_s18 + $0x30] sm:$0xff]  ;;  %v545_v61 = vld [vmem:[%s1155_s18 + $0x38] sm:$0xff]  ;;  %v546_v62 = vld [vmem:[%s1155_s18 + $0x40] sm:$0xff] }
 0x163   : > { %570 = vst [vmem:[%s1155_s18] sm:$0xff] %v554_v51  ;;  %571 = vst [vmem:[%s1155_s18 + $0x8] sm:$0xff] %v555_v52  ;;  %v560_v63 = vadd.f32 %v748_v40, %v544_v60  ;;  %v561_v0 = vadd.f32 %v749_v44, %v545_v61  ;;  %v562_v1 = vadd.f32 %v546_v62, %v481_v35  ;;  %v547_v2 = vld [vmem:[%s1155_s18 + $0x48] sm:$0xff]  ;;  %v548_v3 = vld [vmem:[%s1155_s18 + $0x50] sm:$0xff] }
 0x164   : > { %572 = vst [vmem:[%s1155_s18 + $0x10] sm:$0xff] %v556_v53  ;;  %v549_v4 = vld [vmem:[%s1155_s18 + $0x58] sm:$0xff]  ;;  %573 = vst [vmem:[%s1155_s18 + $0x18] sm:$0xff] %v557_v57  ;;  %v563_v5 = vadd.f32 %v547_v2, %v484_v39  ;;  %v564_v6 = vadd.f32 %v1144_v33, %v548_v3  ;;  %v550_v8 = vld [vmem:[%s1155_s18 + $0x60] sm:$0xff] }
 0x165   : > { %574 = vst [vmem:[%s1155_s18 + $0x20] sm:$0xff] %v558_v58  ;;  %575 = vst [vmem:[%s1155_s18 + $0x28] sm:$0xff] %v559_v59  ;;  %v565_v7 = vadd.f32 %v1146_v37, %v549_v4  ;;  %v551_v9 = vld [vmem:[%s1155_s18 + $0x68] sm:$0xff]  ;;  %v552_v10 = vld [vmem:[%s1155_s18 + $0x70] sm:$0xff]  ;;  %v566_v11 = vadd.f32 %v550_v8, %v1150_v43 }
 0x166   : > { %576 = vst [vmem:[%s1155_s18 + $0x30] sm:$0xff] %v560_v63  ;;  %577 = vst [vmem:[%s1155_s18 + $0x38] sm:$0xff] %v561_v0  ;;  %v567_v12 = vadd.f32 %v551_v9, %v500_v47  ;;  %v568_v13 = vadd.f32 %v1148_v41, %v552_v10  ;;  %v553_v14 = vld [vmem:[%s1155_s18 + $0x78] sm:$0xff] }
 0x167   : > { %578 = vst [vmem:[%s1155_s18 + $0x40] sm:$0xff] %v562_v1  ;;  %579 = vst [vmem:[%s1155_s18 + $0x48] sm:$0xff] %v563_v5  ;;  %v569_v15 = vadd.f32 %v1152_v45, %v553_v14 }
 0x168   : > { %580 = vst [vmem:[%s1155_s18 + $0x50] sm:$0xff] %v564_v6  ;;  %581 = vst [vmem:[%s1155_s18 + $0x58] sm:$0xff] %v565_v7 }
 0x169   : > { %582 = vst [vmem:[%s1155_s18 + $0x60] sm:$0xff] %v566_v11  ;;  %583 = vst [vmem:[%s1155_s18 + $0x68] sm:$0xff] %v567_v12 }
 0x16a   : > { %584 = vst [vmem:[%s1155_s18 + $0x70] sm:$0xff] %v568_v13  ;;  %585 = vst [vmem:[%s1155_s18 + $0x78] sm:$0xff] %v569_v15 }
 0x16b PF: > { %s774_s21 = scalar_select %p1069_p8, [#allocation3], [#allocation9] }
 0x16c   : > { %s1293_s11 = smov (!%p1069_p8, %s1044_s11), 0  ;;  %s601_s24 = sshll.u32 %s1155_s18, 4  ;;  %s1222_s24 = int_to_ptr.vmem [resolvable:$true] %s601_s24 }
 0x16d   : > { %s594_s20 = sld [smem:[%s774_s21 + %s1293_s11]]  ;;  %s1231_s30 = scalar_lea.sflag [#allocation8], %s272_s22 }
 0x16e   : > { %s888_s13 = scalar_lea.vmem %s1222_s24, 2048  ;;  %s971_s11 = smov [#allocation7]  }
 0x16f   : > { %p889_p4 = scmp.ne.s32.totalorder %s1222_s24, %s888_s13  ;;  %s892_s14 = sshll.u32 %s971_s11, 4  ;;  %s893_s14 = int_to_ptr.vmem [resolvable:$false] %s892_s14 }
 0x170   : > { %s894_s15 = scalar_lea.vmem %s893_s14, 4096  ;;  %p895_p7 = scmp.lt.s32.totalorder %s1222_s24, %s893_s14 }
 0x171   : > { %p890_p5 = pnand %p889_p4, %p1069_p8  ;;  %p896_p10 = scmp.lt.s32.totalorder %s894_s15, %s888_s13 }
 0x173   : > { %s709_s26 = sshll.u32 %s594_s20, 11  ;;  %p891_p6 = pneg %p890_p5 }
 0x174   : > { %s1227_s29 = scalar_lea.hbm %s1280_s5, %s709_s26  ;;  %p897_p11 = por %p896_p10, %p895_p7 }
 0x176   : > { %p898_p12 = pnand %p897_p11, %p891_p6 }
 0x178   : > { %901 = shalt.err (!%p898_p12)
}
 0x179   : > { %s902_s22 = scalar_lea.hbm %s1227_s29, 2048  ;;  %s906_s8 = scalar_lea.hbm %s1280_s5, 4096 }
 0x17a   : > { %p903_p13 = scmp.ne.s32.totalorder %s1227_s29, %s902_s22  ;;  %p907_p2 = scmp.lt.s32.totalorder %s1227_s29, %s1280_s5 }
 0x17b   : > { %p908_p3 = scmp.lt.s32.totalorder %s906_s8, %s902_s22 }
 0x17c   : > { %p904_p0 = pnand %p903_p13, %p1069_p8 }
 0x17d   : > { %p909_p4 = por %p908_p3, %p907_p2 }
 0x17e   : > { %p905_p1 = pneg %p904_p0 }
 0x180   : > { %p910_p5 = pnand %p909_p4, %p905_p1 }
 0x182   : > { %913 = shalt.err (!%p910_p5)
}
 0x183   : > { %s972_s21 = smov 128   ;;  %s973_s20 = smov 8  }
 0x184   : > { %776 = dma.vmem_to_hbm [thread:$0]  (%p1069_p8), %s1222_s24, 2048, %s1227_s29, %s1231_s30, %s972_s21, %s972_s21, %s973_s20  }
 0x185 PF: > { %p782_p6 = scmp.ge.s32.totalorder %s966_s10, 2  ;;  %s616_s26 = sand.u32 1, %s946_s6  }
 0x186   : > { %s617_s0 = scalar_lea.sflag [#allocation8], %s616_s26 }
 0x187   : > { %p779_p7 = pnand %p782_p6, %p1073_p9 }
 0x189   : > { %p780_p10 = pneg %p779_p7 }
 0x18b   : > { %941 = dma.done.wait (%p780_p10), %s617_s0, 2048  }
 0x18c   : > { %943 = vsyncadd (%p780_p10), %s617_s0, 4294965248  ;;  %p29_p8 = scmp.ge.s32.totalorder %s1047_s12, 6   ;;  %s1286_s6 = smov %s950_s7 }
 0x18d   : > { %s1287_s7 = smov %s954_s2  ;;  %s1288_s2 = smov %s1082_s28 }
 0x18e   : > { %s1289_s8 = smov %s962_s9  ;;  %s1290_s9 = smov %s1079_s27 }
 0x18f   : > { %s1291_s10 = smov %s1047_s12  ;;  %31 = sbr.rel (!%p29_p8) target bundleno = 39 (0x27), region = 118 }
 0x194   :  { %622 = vsyncpa [#allocation8], 1 }
 0x195   :  { %624 = vsyncpa [#allocation8 + $0x1], 1 }

</bundles_post_ra>
